<compile_context>
chip_gen: v6e
topology: v6e:2x2x1
jax: 0.10.0
libtpu: 0.0.40
codegen_flags: <defaults>
</compile_context>

<pallas_src>
import functools

import jax
import jax.numpy as jnp
from jax.experimental import pallas as pl
from jax.experimental.pallas import tpu as pltpu


def _log_sigmoid_stable(x):
    # logsig(x) = min(x, 0) - log(1 + exp(-|x|)); one exp + one log, no dead branch.
    return jnp.minimum(x, 0.0) - jnp.log(1.0 + jnp.exp(-jnp.abs(x)))


def _dia_multi_dense_kernel(
    s_ref, w1_ref, b1_ref, w2_ref, b2_ref,
    w30_ref, b30_ref, w31_ref, b31_ref,
    atg_ref, pos_ref,
    rowloss_ref, pred_ref,
):
    TB, A = pred_ref.shape
    L = atg_ref.shape[1]

    # ---- net: Linear -> ReLU -> Linear -> LeakyReLU(0.2); bf16 MXU, f32 accumulate ----
    s = s_ref[...]                                                       # bf16 [TB, S]
    h = jnp.dot(s, w1_ref[...], preferred_element_type=jnp.float32) + b1_ref[...]
    h = jnp.maximum(h, 0.0)
    z = jnp.dot(h.astype(jnp.bfloat16), w2_ref[...],
                preferred_element_type=jnp.float32) + b2_ref[...]
    h_s = jnp.where(z >= 0.0, z, 0.2 * z).astype(jnp.bfloat16)           # bf16 [TB, A//4]

    # ---- fused last_layers: two lane-aligned matmuls (logit 0 / logit 1 of each pair) ----
    logits0 = jnp.dot(h_s, w30_ref[...],
                      preferred_element_type=jnp.float32) + b30_ref[...]  # f32 [TB, A]
    logits1 = jnp.dot(h_s, w31_ref[...],
                      preferred_element_type=jnp.float32) + b31_ref[...]  # f32 [TB, A]

    # ---- pred_act_tsr = onehot2id(action_rep): argmax inside each pair (ties -> 0) ----
    pred_ref[...] = (logits1 > logits0).astype(jnp.int32)

    # ---- proc_tgt_tsr: masked scatter-OR of gold action ids, pure 2-D VPU work ----
    atg = atg_ref[...]                                                   # int32 [TB, L]
    pos = pos_ref[...]                                                   # int32 [TB, 1]
    lane = jax.lax.broadcasted_iota(jnp.int32, (TB, A), 1)               # [TB, A]
    tgt = jnp.zeros((TB, A), jnp.float32)
    for l in range(L):                                                   # L is tiny (max_len)
        hit = jnp.logical_and(atg[:, l:l + 1] == lane, pos > l)          # [TB, A] bool
        tgt = jnp.maximum(tgt, hit.astype(jnp.float32))

    # ---- MultiLabelSoftMarginLoss(action_rep, id2onehot(proc_tgt)), per-row sum only ----
    # id2onehot: pair target for action j is (1 - t_j, t_j).  Using
    #   y*logsig(x) + (1-y)*logsig(-x) = logsig(x) - (1-y)*x
    # term0 (target 1-t): logsig(l0) - t*l0 ;  term1 (target t): logsig(l1) - (1-t)*l1
    terms = (_log_sigmoid_stable(logits0) - tgt * logits0
             + _log_sigmoid_stable(logits1) - (1.0 - tgt) * logits1)     # f32 [TB, A]
    rowloss_ref[...] = jnp.sum(terms, axis=1, keepdims=True)             # [TB, 1]


def init_params(key, s_dim, h_dim, a_dim):
    """Deterministic synthetic weights matching the PyTorch module's shapes."""
    a4 = a_dim // 4
    k1, k2, k3, k4, k5, k6 = jax.random.split(key, 6)
    scale = 0.1
    w1 = scale * jax.random.normal(k1, (s_dim, h_dim), jnp.float32)      # Linear(s_dim, h_dim).weight.T
    b1 = scale * jax.random.normal(k2, (1, h_dim), jnp.float32)
    w2 = scale * jax.random.normal(k3, (h_dim, a4), jnp.float32)         # Linear(h_dim, a_dim//4).weight.T
    b2 = scale * jax.random.normal(k4, (1, a4), jnp.float32)
    # a_dim Linear(a_dim//4, 2) layers, split by output index:
    #   w3_0[:, j] / b3_0[0, j] -> logit 0 of pair j ;  w3_1 / b3_1 -> logit 1 of pair j.
    w3_pairs = scale * jax.random.normal(k5, (a_dim, a4, 2), jnp.float32)
    b3_pairs = scale * jax.random.normal(k6, (a_dim, 2), jnp.float32)
    return dict(
        w1=w1, b1=b1, w2=w2, b2=b2,
        w3_0=w3_pairs[:, :, 0].T, b3_0=b3_pairs[:, 0].reshape(1, a_dim),
        w3_1=w3_pairs[:, :, 1].T, b3_1=b3_pairs[:, 1].reshape(1, a_dim),
    )


def _round_up(x, m):
    return (x + m - 1) // m * m


@functools.partial(jax.jit, static_argnames=("a_dim",))
def dia_multi_dense_forward(params, s, a_target_gold, s_target_pos, a_dim):
    B, s_dim = s.shape
    L = a_target_gold.shape[1]
    if s_target_pos.ndim == 1:
        s_target_pos = s_target_pos.reshape(B, 1)

    # Batch tiling: TB up to 512 (>=512 keeps per-step overhead amortized near roofline);
    # for small B a single full-batch tile (rounded to the sublane multiple) is used.
    TB = 512 if B >= 512 else _round_up(B, 8)
    B_pad = _round_up(B, TB)
    num_tiles = B_pad // TB

    def pad_rows(x):
        return x if B_pad == B else jnp.pad(x, ((0, B_pad - B), (0, 0)))

    # bf16 only on MXU inputs; biases / elementwise epilogue stay f32.
    s_bf = pad_rows(s).astype(jnp.bfloat16)
    atg = pad_rows(a_target_gold.astype(jnp.int32))
    pos = pad_rows(s_target_pos.astype(jnp.int32))
    w1 = params["w1"].astype(jnp.bfloat16)
    w2 = params["w2"].astype(jnp.bfloat16)
    w30 = params["w3_0"].astype(jnp.bfloat16)
    w31 = params["w3_1"].astype(jnp.bfloat16)
    b1, b2, b30, b31 = params["b1"], params["b2"], params["b3_0"], params["b3_1"]
    h_dim = w1.shape[1]
    a4 = w2.shape[1]

    tiled = lambda i: (i, 0)     # batch-tiled operands
    rep = lambda i: (0, 0)       # replicated weights / biases

    rowloss, pred = pl.pallas_call(
        _dia_multi_dense_kernel,
        grid=(num_tiles,),
        in_specs=[
            pl.BlockSpec((TB, s_dim), tiled),     # s
            pl.BlockSpec((s_dim, h_dim), rep),    # w1
            pl.BlockSpec((1, h_dim), rep),        # b1
            pl.BlockSpec((h_dim, a4), rep),       # w2
            pl.BlockSpec((1, a4), rep),           # b2
            pl.BlockSpec((a4, a_dim), rep),       # w3_0
            pl.BlockSpec((1, a_dim), rep),        # b3_0
            pl.BlockSpec((a4, a_dim), rep),       # w3_1
            pl.BlockSpec((1, a_dim), rep),        # b3_1
            pl.BlockSpec((TB, L), tiled),         # a_target_gold
            pl.BlockSpec((TB, 1), tiled),         # s_target_pos
        ],
        out_specs=(
            pl.BlockSpec((TB, 1), tiled),         # per-row loss sums
            pl.BlockSpec((TB, a_dim), tiled),     # pred_act_tsr
        ),
        out_shape=(
            jax.ShapeDtypeStruct((B_pad, 1), jnp.float32),
            jax.ShapeDtypeStruct((B_pad, a_dim), jnp.int32),
        ),
        compiler_params=pltpu.CompilerParams(
            dimension_semantics=("parallel",),    # shard batch tiles across TCs (v7x)
        ),
    )(s_bf, w1, b1, w2, b2, w30, b30, w31, b31, atg, pos)

    # Finish the mean in the wrapper (tiny B-element reduction); padded rows sliced off.
    loss_pred = -jnp.sum(rowloss[:B, 0]) / (2.0 * a_dim * B)
    pred = pred[:B]

    # Assemble the same 10-tuple the PyTorch forward returns (most entries are zeros).
    z1 = jnp.zeros((1,), jnp.float32)
    return (
        z1,                                      # FloatTensor([0])
        jnp.zeros((B, a_dim), jnp.float32),      # zeros(b, a_dim)
        loss_pred,                               # loss_pred
        pred,                                    # pred_act_tsr
        z1,
        jnp.zeros_like(s),
        z1,
        z1,
        jnp.zeros((B,), jnp.float32),
        jnp.zeros((B,), jnp.float32),
    )


def _reference_forward(params, s, a_target_gold, s_target_pos, a_dim):
    """Pure-jnp reference (same bf16 matmul casts, direct PyTorch-form loss)."""
    bf = jnp.bfloat16
    h = jnp.maximum(
        jnp.dot(s.astype(bf), params["w1"].astype(bf),
                preferred_element_type=jnp.float32) + params["b1"], 0.0)
    z = jnp.dot(h.astype(bf), params["w2"].astype(bf),
                preferred_element_type=jnp.float32) + params["b2"]
    h_s = jnp.where(z >= 0, z, 0.2 * z).astype(bf)
    l0 = jnp.dot(h_s, params["w3_0"].astype(bf),
                 preferred_element_type=jnp.float32) + params["b3_0"]
    l1 = jnp.dot(h_s, params["w3_1"].astype(bf),
                 preferred_element_type=jnp.float32) + params["b3_1"]
    pred = (l1 > l0).astype(jnp.int32)
    B, L = a_target_gold.shape
    pos = s_target_pos.reshape(B, 1)
    mask = (jnp.arange(L)[None, :] < pos).astype(jnp.float32)
    onehot = jax.nn.one_hot(a_target_gold, a_dim)
    tgt = jnp.max(onehot * mask[:, :, None], axis=1)
    ls = jax.nn.log_sigmoid
    term0 = (1 - tgt) * ls(l0) + tgt * ls(-l0)
    term1 = tgt * ls(l1) + (1 - tgt) * ls(-l1)
    loss = jnp.mean(-(jnp.sum(term0, axis=1) + jnp.sum(term1, axis=1)) / (2.0 * a_dim))
    return loss, pred


if __name__ == "__main__":
    # small, forward-consistent shapes
    B = 8         # batch
    S_DIM = 32    # cfg.s_dim
    H_DIM = 32    # cfg.h_dim
    A_DIM = 16    # cfg.a_dim  (a_dim//4 = 4; action_rep has 2*a_dim = 32 logits)
    MAX_LEN = 8   # cfg.max_len

    key = jax.random.PRNGKey(0)
    kp, ks, ka, kpos = jax.random.split(key, 4)

    params = init_params(kp, S_DIM, H_DIM, A_DIM)
    s = jax.random.normal(ks, (B, S_DIM), jnp.float32)
    a_target_gold = jax.random.randint(ka, (B, MAX_LEN), 0, A_DIM, jnp.int32)
    s_target_pos = jax.random.randint(kpos, (B, 1), 0, MAX_LEN + 1, jnp.int32)

    outs = dia_multi_dense_forward(params, s, a_target_gold, s_target_pos, A_DIM)
    outs = jax.block_until_ready(outs)

    loss_pred, pred_act_tsr = outs[2], outs[3]

    # sanity check against a pure-JAX reference of the same math
    ref_loss, ref_pred = _reference_forward(params, s, a_target_gold, s_target_pos, A_DIM)
    assert jnp.allclose(loss_pred, ref_loss, atol=1e-4, rtol=1e-4), (loss_pred, ref_loss)
    assert jnp.array_equal(pred_act_tsr, ref_pred)

    print("KERNEL_OK")
</pallas_src>

<mosaic_0001>
module attributes {stable_mosaic.version = 11 : i64} {
  func.func @_dia_multi_dense_kernel(%arg0: i32, %arg1: memref<8x32xbf16, #tpu.memory_space<vmem>>, %arg2: memref<32x32xbf16, #tpu.memory_space<vmem>>, %arg3: memref<1x32xf32, #tpu.memory_space<vmem>>, %arg4: memref<32x4xbf16, #tpu.memory_space<vmem>>, %arg5: memref<1x4xf32, #tpu.memory_space<vmem>>, %arg6: memref<4x16xbf16, #tpu.memory_space<vmem>>, %arg7: memref<1x16xf32, #tpu.memory_space<vmem>>, %arg8: memref<4x16xbf16, #tpu.memory_space<vmem>>, %arg9: memref<1x16xf32, #tpu.memory_space<vmem>>, %arg10: memref<8x8xi32, #tpu.memory_space<vmem>>, %arg11: memref<8x1xi32, #tpu.memory_space<vmem>>, %arg12: memref<8x1xf32, #tpu.memory_space<vmem>>, %arg13: memref<8x16xi32, #tpu.memory_space<vmem>>) attributes {dimension_semantics = [#tpu.dimension_semantics<parallel>], iteration_bounds = array<i64: 1>, scalar_prefetch = 0 : i64, scratch_operands = 0 : i64, tpu.core_type = #tpu.core_type<tc>, window_params = [{transform_indices = @transform_0, window_bounds = array<i64: 8, 32>}, {pipeline_mode = #tpu.pipeline_mode<synchronous>, transform_indices = @transform_1, window_bounds = array<i64: 32, 32>}, {pipeline_mode = #tpu.pipeline_mode<synchronous>, transform_indices = @transform_2, window_bounds = array<i64: 1, 32>}, {pipeline_mode = #tpu.pipeline_mode<synchronous>, transform_indices = @transform_3, window_bounds = array<i64: 32, 4>}, {pipeline_mode = #tpu.pipeline_mode<synchronous>, transform_indices = @transform_4, window_bounds = array<i64: 1, 4>}, {pipeline_mode = #tpu.pipeline_mode<synchronous>, transform_indices = @transform_5, window_bounds = array<i64: 4, 16>}, {pipeline_mode = #tpu.pipeline_mode<synchronous>, transform_indices = @transform_6, window_bounds = array<i64: 1, 16>}, {pipeline_mode = #tpu.pipeline_mode<synchronous>, transform_indices = @transform_7, window_bounds = array<i64: 4, 16>}, {pipeline_mode = #tpu.pipeline_mode<synchronous>, transform_indices = @transform_8, window_bounds = array<i64: 1, 16>}, {transform_indices = @transform_9, window_bounds = array<i64: 8, 8>}, {transform_indices = @transform_10, window_bounds = array<i64: 8, 1>}, {transform_indices = @transform_11, window_bounds = array<i64: 8, 1>}, {transform_indices = @transform_12, window_bounds = array<i64: 8, 16>}]} {
    %c0 = arith.constant 0 : index
    %c0_0 = arith.constant 0 : index
    %0 = vector.load %arg1[%c0, %c0_0] : memref<8x32xbf16, #tpu.memory_space<vmem>>, vector<8x32xbf16>
    %c0_1 = arith.constant 0 : index
    %c0_2 = arith.constant 0 : index
    %1 = vector.load %arg2[%c0_1, %c0_2] : memref<32x32xbf16, #tpu.memory_space<vmem>>, vector<32x32xbf16>
    %cst = arith.constant dense<0.000000e+00> : vector<8x32xf32>
    %2 = tpu.matmul %0, %1, %cst {dimension_numbers = #tpu.dot_dimension_numbers<[1], [0], [0], [1], [0, 0, 1, 1], [], []>} : vector<8x32xbf16>, vector<32x32xbf16>, vector<8x32xf32> -> vector<8x32xf32>
    %c0_3 = arith.constant 0 : index
    %c0_4 = arith.constant 0 : index
    %3 = vector.load %arg3[%c0_3, %c0_4] : memref<1x32xf32, #tpu.memory_space<vmem>>, vector<1x32xf32>
    %4 = vector.broadcast %3 : vector<1x32xf32> to vector<8x32xf32>
    %5 = arith.addf %2, %4 : vector<8x32xf32>
    %cst_5 = arith.constant 0.000000e+00 : f32
    %6 = vector.broadcast %cst_5 : f32 to vector<8x32xf32>
    %7 = arith.maximumf %5, %6 : vector<8x32xf32>
    %8 = arith.truncf %7 : vector<8x32xf32> to vector<8x32xbf16>
    %c0_6 = arith.constant 0 : index
    %c0_7 = arith.constant 0 : index
    %9 = vector.load %arg4[%c0_6, %c0_7] : memref<32x4xbf16, #tpu.memory_space<vmem>>, vector<32x4xbf16>
    %cst_8 = arith.constant dense<0.000000e+00> : vector<8x4xf32>
    %10 = tpu.matmul %8, %9, %cst_8 {dimension_numbers = #tpu.dot_dimension_numbers<[1], [0], [0], [1], [0, 0, 1, 1], [], []>} : vector<8x32xbf16>, vector<32x4xbf16>, vector<8x4xf32> -> vector<8x4xf32>
    %c0_9 = arith.constant 0 : index
    %c0_10 = arith.constant 0 : index
    %11 = vector.load %arg5[%c0_9, %c0_10] : memref<1x4xf32, #tpu.memory_space<vmem>>, vector<1x4xf32>
    %12 = vector.broadcast %11 : vector<1x4xf32> to vector<8x4xf32>
    %13 = arith.addf %10, %12 : vector<8x4xf32>
    %cst_11 = arith.constant 0.000000e+00 : f32
    %14 = vector.broadcast %cst_11 : f32 to vector<8x4xf32>
    %15 = arith.cmpf oge, %13, %14 : vector<8x4xf32>
    %cst_12 = arith.constant 2.000000e-01 : f32
    %16 = vector.broadcast %cst_12 : f32 to vector<8x4xf32>
    %17 = arith.mulf %16, %13 : vector<8x4xf32>
    %18 = arith.select %15, %13, %17 : vector<8x4xi1>, vector<8x4xf32>
    %19 = arith.truncf %18 : vector<8x4xf32> to vector<8x4xbf16>
    %c0_13 = arith.constant 0 : index
    %c0_14 = arith.constant 0 : index
    %20 = vector.load %arg6[%c0_13, %c0_14] : memref<4x16xbf16, #tpu.memory_space<vmem>>, vector<4x16xbf16>
    %cst_15 = arith.constant dense<0.000000e+00> : vector<8x16xf32>
    %21 = tpu.matmul %19, %20, %cst_15 {dimension_numbers = #tpu.dot_dimension_numbers<[1], [0], [0], [1], [0, 0, 1, 1], [], []>} : vector<8x4xbf16>, vector<4x16xbf16>, vector<8x16xf32> -> vector<8x16xf32>
    %c0_16 = arith.constant 0 : index
    %c0_17 = arith.constant 0 : index
    %22 = vector.load %arg7[%c0_16, %c0_17] : memref<1x16xf32, #tpu.memory_space<vmem>>, vector<1x16xf32>
    %23 = vector.broadcast %22 : vector<1x16xf32> to vector<8x16xf32>
    %24 = arith.addf %21, %23 : vector<8x16xf32>
    %c0_18 = arith.constant 0 : index
    %c0_19 = arith.constant 0 : index
    %25 = vector.load %arg8[%c0_18, %c0_19] : memref<4x16xbf16, #tpu.memory_space<vmem>>, vector<4x16xbf16>
    %cst_20 = arith.constant dense<0.000000e+00> : vector<8x16xf32>
    %26 = tpu.matmul %19, %25, %cst_20 {dimension_numbers = #tpu.dot_dimension_numbers<[1], [0], [0], [1], [0, 0, 1, 1], [], []>} : vector<8x4xbf16>, vector<4x16xbf16>, vector<8x16xf32> -> vector<8x16xf32>
    %c0_21 = arith.constant 0 : index
    %c0_22 = arith.constant 0 : index
    %27 = vector.load %arg9[%c0_21, %c0_22] : memref<1x16xf32, #tpu.memory_space<vmem>>, vector<1x16xf32>
    %28 = vector.broadcast %27 : vector<1x16xf32> to vector<8x16xf32>
    %29 = arith.addf %26, %28 : vector<8x16xf32>
    %30 = arith.cmpf ogt, %29, %24 : vector<8x16xf32>
    %31 = arith.extui %30 : vector<8x16xi1> to vector<8x16xi32>
    %c0_23 = arith.constant 0 : index
    %c0_24 = arith.constant 0 : index
    %32 = vector.load %arg13[%c0_23, %c0_24] : memref<8x16xi32, #tpu.memory_space<vmem>>, vector<8x16xi32>
    tpu.vector_store %arg13[%c0_23, %c0_24], %31 {strides = array<i32>} : memref<8x16xi32, #tpu.memory_space<vmem>>, vector<8x16xi32>,
    %c0_25 = arith.constant 0 : index
    %c0_26 = arith.constant 0 : index
    %33 = vector.load %arg10[%c0_25, %c0_26] : memref<8x8xi32, #tpu.memory_space<vmem>>, vector<8x8xi32>
    %c0_27 = arith.constant 0 : index
    %c0_28 = arith.constant 0 : index
    %34 = vector.load %arg11[%c0_27, %c0_28] : memref<8x1xi32, #tpu.memory_space<vmem>>, vector<8x1xi32>
    %35 = tpu.iota {dimensions = array<i32: 1>} : vector<8x16xi32>
    %cst_29 = arith.constant 0.000000e+00 : f32
    %36 = vector.broadcast %cst_29 : f32 to vector<8x16xf32>
    %37 = vector.extract_strided_slice %33 {offsets = [0, 0], sizes = [8, 1], strides = [1, 1]} : vector<8x8xi32> to vector<8x1xi32>
    %38 = vector.broadcast %37 : vector<8x1xi32> to vector<8x16xi32>
    %39 = arith.cmpi eq, %38, %35 : vector<8x16xi32>
    %c0_i32 = arith.constant 0 : i32
    %40 = vector.broadcast %c0_i32 : i32 to vector<8x1xi32>
    %41 = arith.cmpi sgt, %34, %40 : vector<8x1xi32>
    %42 = vector.broadcast %41 : vector<8x1xi1> to vector<8x16xi1>
    %43 = arith.andi %39, %42 : vector<8x16xi1>
    %44 = arith.extui %43 : vector<8x16xi1> to vector<8x16xi32>
    %45 = arith.sitofp %44 : vector<8x16xi32> to vector<8x16xf32>
    %46 = arith.maximumf %36, %45 : vector<8x16xf32>
    %47 = vector.extract_strided_slice %33 {offsets = [0, 1], sizes = [8, 1], strides = [1, 1]} : vector<8x8xi32> to vector<8x1xi32>
    %48 = vector.broadcast %47 : vector<8x1xi32> to vector<8x16xi32>
    %49 = arith.cmpi eq, %48, %35 : vector<8x16xi32>
    %c1_i32 = arith.constant 1 : i32
    %50 = vector.broadcast %c1_i32 : i32 to vector<8x1xi32>
    %51 = arith.cmpi sgt, %34, %50 : vector<8x1xi32>
    %52 = vector.broadcast %51 : vector<8x1xi1> to vector<8x16xi1>
    %53 = arith.andi %49, %52 : vector<8x16xi1>
    %54 = arith.extui %53 : vector<8x16xi1> to vector<8x16xi32>
    %55 = arith.sitofp %54 : vector<8x16xi32> to vector<8x16xf32>
    %56 = arith.maximumf %46, %55 : vector<8x16xf32>
    %57 = vector.extract_strided_slice %33 {offsets = [0, 2], sizes = [8, 1], strides = [1, 1]} : vector<8x8xi32> to vector<8x1xi32>
    %58 = vector.broadcast %57 : vector<8x1xi32> to vector<8x16xi32>
    %59 = arith.cmpi eq, %58, %35 : vector<8x16xi32>
    %c2_i32 = arith.constant 2 : i32
    %60 = vector.broadcast %c2_i32 : i32 to vector<8x1xi32>
    %61 = arith.cmpi sgt, %34, %60 : vector<8x1xi32>
    %62 = vector.broadcast %61 : vector<8x1xi1> to vector<8x16xi1>
    %63 = arith.andi %59, %62 : vector<8x16xi1>
    %64 = arith.extui %63 : vector<8x16xi1> to vector<8x16xi32>
    %65 = arith.sitofp %64 : vector<8x16xi32> to vector<8x16xf32>
    %66 = arith.maximumf %56, %65 : vector<8x16xf32>
    %67 = vector.extract_strided_slice %33 {offsets = [0, 3], sizes = [8, 1], strides = [1, 1]} : vector<8x8xi32> to vector<8x1xi32>
    %68 = vector.broadcast %67 : vector<8x1xi32> to vector<8x16xi32>
    %69 = arith.cmpi eq, %68, %35 : vector<8x16xi32>
    %c3_i32 = arith.constant 3 : i32
    %70 = vector.broadcast %c3_i32 : i32 to vector<8x1xi32>
    %71 = arith.cmpi sgt, %34, %70 : vector<8x1xi32>
    %72 = vector.broadcast %71 : vector<8x1xi1> to vector<8x16xi1>
    %73 = arith.andi %69, %72 : vector<8x16xi1>
    %74 = arith.extui %73 : vector<8x16xi1> to vector<8x16xi32>
    %75 = arith.sitofp %74 : vector<8x16xi32> to vector<8x16xf32>
    %76 = arith.maximumf %66, %75 : vector<8x16xf32>
    %77 = vector.extract_strided_slice %33 {offsets = [0, 4], sizes = [8, 1], strides = [1, 1]} : vector<8x8xi32> to vector<8x1xi32>
    %78 = vector.broadcast %77 : vector<8x1xi32> to vector<8x16xi32>
    %79 = arith.cmpi eq, %78, %35 : vector<8x16xi32>
    %c4_i32 = arith.constant 4 : i32
    %80 = vector.broadcast %c4_i32 : i32 to vector<8x1xi32>
    %81 = arith.cmpi sgt, %34, %80 : vector<8x1xi32>
    %82 = vector.broadcast %81 : vector<8x1xi1> to vector<8x16xi1>
    %83 = arith.andi %79, %82 : vector<8x16xi1>
    %84 = arith.extui %83 : vector<8x16xi1> to vector<8x16xi32>
    %85 = arith.sitofp %84 : vector<8x16xi32> to vector<8x16xf32>
    %86 = arith.maximumf %76, %85 : vector<8x16xf32>
    %87 = vector.extract_strided_slice %33 {offsets = [0, 5], sizes = [8, 1], strides = [1, 1]} : vector<8x8xi32> to vector<8x1xi32>
    %88 = vector.broadcast %87 : vector<8x1xi32> to vector<8x16xi32>
    %89 = arith.cmpi eq, %88, %35 : vector<8x16xi32>
    %c5_i32 = arith.constant 5 : i32
    %90 = vector.broadcast %c5_i32 : i32 to vector<8x1xi32>
    %91 = arith.cmpi sgt, %34, %90 : vector<8x1xi32>
    %92 = vector.broadcast %91 : vector<8x1xi1> to vector<8x16xi1>
    %93 = arith.andi %89, %92 : vector<8x16xi1>
    %94 = arith.extui %93 : vector<8x16xi1> to vector<8x16xi32>
    %95 = arith.sitofp %94 : vector<8x16xi32> to vector<8x16xf32>
    %96 = arith.maximumf %86, %95 : vector<8x16xf32>
    %97 = vector.extract_strided_slice %33 {offsets = [0, 6], sizes = [8, 1], strides = [1, 1]} : vector<8x8xi32> to vector<8x1xi32>
    %98 = vector.broadcast %97 : vector<8x1xi32> to vector<8x16xi32>
    %99 = arith.cmpi eq, %98, %35 : vector<8x16xi32>
    %c6_i32 = arith.constant 6 : i32
    %100 = vector.broadcast %c6_i32 : i32 to vector<8x1xi32>
    %101 = arith.cmpi sgt, %34, %100 : vector<8x1xi32>
    %102 = vector.broadcast %101 : vector<8x1xi1> to vector<8x16xi1>
    %103 = arith.andi %99, %102 : vector<8x16xi1>
    %104 = arith.extui %103 : vector<8x16xi1> to vector<8x16xi32>
    %105 = arith.sitofp %104 : vector<8x16xi32> to vector<8x16xf32>
    %106 = arith.maximumf %96, %105 : vector<8x16xf32>
    %107 = vector.extract_strided_slice %33 {offsets = [0, 7], sizes = [8, 1], strides = [1, 1]} : vector<8x8xi32> to vector<8x1xi32>
    %108 = vector.broadcast %107 : vector<8x1xi32> to vector<8x16xi32>
    %109 = arith.cmpi eq, %108, %35 : vector<8x16xi32>
    %c7_i32 = arith.constant 7 : i32
    %110 = vector.broadcast %c7_i32 : i32 to vector<8x1xi32>
    %111 = arith.cmpi sgt, %34, %110 : vector<8x1xi32>
    %112 = vector.broadcast %111 : vector<8x1xi1> to vector<8x16xi1>
    %113 = arith.andi %109, %112 : vector<8x16xi1>
    %114 = arith.extui %113 : vector<8x16xi1> to vector<8x16xi32>
    %115 = arith.sitofp %114 : vector<8x16xi32> to vector<8x16xf32>
    %116 = arith.maximumf %106, %115 : vector<8x16xf32>
    %cst_30 = arith.constant 0.000000e+00 : f32
    %117 = vector.broadcast %cst_30 : f32 to vector<8x16xf32>
    %118 = arith.minimumf %24, %117 : vector<8x16xf32>
    %119 = math.absf %24 : vector<8x16xf32>
    %cst_31 = arith.constant 0.000000e+00 : f32
    %120 = vector.broadcast %cst_31 : f32 to vector<8x16xf32>
    %121 = arith.subf %120, %119 : vector<8x16xf32>
    %122 = math.exp %121 : vector<8x16xf32>
    %cst_32 = arith.constant 1.000000e+00 : f32
    %123 = vector.broadcast %cst_32 : f32 to vector<8x16xf32>
    %124 = arith.addf %123, %122 : vector<8x16xf32>
    %125 = math.log %124 : vector<8x16xf32>
    %126 = arith.subf %118, %125 : vector<8x16xf32>
    %127 = arith.mulf %116, %24 : vector<8x16xf32>
    %128 = arith.subf %126, %127 : vector<8x16xf32>
    %cst_33 = arith.constant 0.000000e+00 : f32
    %129 = vector.broadcast %cst_33 : f32 to vector<8x16xf32>
    %130 = arith.minimumf %29, %129 : vector<8x16xf32>
    %131 = math.absf %29 : vector<8x16xf32>
    %cst_34 = arith.constant 0.000000e+00 : f32
    %132 = vector.broadcast %cst_34 : f32 to vector<8x16xf32>
    %133 = arith.subf %132, %131 : vector<8x16xf32>
    %134 = math.exp %133 : vector<8x16xf32>
    %cst_35 = arith.constant 1.000000e+00 : f32
    %135 = vector.broadcast %cst_35 : f32 to vector<8x16xf32>
    %136 = arith.addf %135, %134 : vector<8x16xf32>
    %137 = math.log %136 : vector<8x16xf32>
    %138 = arith.subf %130, %137 : vector<8x16xf32>
    %139 = arith.addf %128, %138 : vector<8x16xf32>
    %cst_36 = arith.constant 1.000000e+00 : f32
    %140 = vector.broadcast %cst_36 : f32 to vector<8x16xf32>
    %141 = arith.subf %140, %116 : vector<8x16xf32>
    %142 = arith.mulf %141, %29 : vector<8x16xf32>
    %143 = arith.subf %139, %142 : vector<8x16xf32>
    %cst_37 = arith.constant dense<0.000000e+00> : vector<8xf32>
    %144 = vector.multi_reduction <add>, %143, %cst_37 [1] : vector<8x16xf32> to vector<8xf32>
    %145 = vector.shape_cast %144 : vector<8xf32> to vector<8x1xf32>
    %c0_38 = arith.constant 0 : index
    %c0_39 = arith.constant 0 : index
    %146 = vector.load %arg12[%c0_38, %c0_39] : memref<8x1xf32, #tpu.memory_space<vmem>>, vector<8x1xf32>
    tpu.vector_store %arg12[%c0_38, %c0_39], %145 {strides = array<i32>} : memref<8x1xf32, #tpu.memory_space<vmem>>, vector<8x1xf32>,
    return
  }
  func.func @transform_0(%arg0: i32) -> (i32, i32) {
    %c0_i32 = arith.constant 0 : i32
    %c0_i32_0 = arith.constant 0 : i32
    return %arg0, %c0_i32 : i32, i32
  }
  func.func @transform_1(%arg0: i32) -> (i32, i32) {
    %c0_i32 = arith.constant 0 : i32
    %c0_i32_0 = arith.constant 0 : i32
    %c0_i32_1 = arith.constant 0 : i32
    return %c0_i32, %c0_i32_0 : i32, i32
  }
  func.func @transform_2(%arg0: i32) -> (i32, i32) {
    %c0_i32 = arith.constant 0 : i32
    %c0_i32_0 = arith.constant 0 : i32
    %c0_i32_1 = arith.constant 0 : i32
    return %c0_i32, %c0_i32_0 : i32, i32
  }
  func.func @transform_3(%arg0: i32) -> (i32, i32) {
    %c0_i32 = arith.constant 0 : i32
    %c0_i32_0 = arith.constant 0 : i32
    %c0_i32_1 = arith.constant 0 : i32
    return %c0_i32, %c0_i32_0 : i32, i32
  }
  func.func @transform_4(%arg0: i32) -> (i32, i32) {
    %c0_i32 = arith.constant 0 : i32
    %c0_i32_0 = arith.constant 0 : i32
    %c0_i32_1 = arith.constant 0 : i32
    return %c0_i32, %c0_i32_0 : i32, i32
  }
  func.func @transform_5(%arg0: i32) -> (i32, i32) {
    %c0_i32 = arith.constant 0 : i32
    %c0_i32_0 = arith.constant 0 : i32
    %c0_i32_1 = arith.constant 0 : i32
    return %c0_i32, %c0_i32_0 : i32, i32
  }
  func.func @transform_6(%arg0: i32) -> (i32, i32) {
    %c0_i32 = arith.constant 0 : i32
    %c0_i32_0 = arith.constant 0 : i32
    %c0_i32_1 = arith.constant 0 : i32
    return %c0_i32, %c0_i32_0 : i32, i32
  }
  func.func @transform_7(%arg0: i32) -> (i32, i32) {
    %c0_i32 = arith.constant 0 : i32
    %c0_i32_0 = arith.constant 0 : i32
    %c0_i32_1 = arith.constant 0 : i32
    return %c0_i32, %c0_i32_0 : i32, i32
  }
  func.func @transform_8(%arg0: i32) -> (i32, i32) {
    %c0_i32 = arith.constant 0 : i32
    %c0_i32_0 = arith.constant 0 : i32
    %c0_i32_1 = arith.constant 0 : i32
    return %c0_i32, %c0_i32_0 : i32, i32
  }
  func.func @transform_9(%arg0: i32) -> (i32, i32) {
    %c0_i32 = arith.constant 0 : i32
    %c0_i32_0 = arith.constant 0 : i32
    return %arg0, %c0_i32 : i32, i32
  }
  func.func @transform_10(%arg0: i32) -> (i32, i32) {
    %c0_i32 = arith.constant 0 : i32
    %c0_i32_0 = arith.constant 0 : i32
    return %arg0, %c0_i32 : i32, i32
  }
  func.func @transform_11(%arg0: i32) -> (i32, i32) {
    %c0_i32 = arith.constant 0 : i32
    %c0_i32_0 = arith.constant 0 : i32
    return %arg0, %c0_i32 : i32, i32
  }
  func.func @transform_12(%arg0: i32) -> (i32, i32) {
    %c0_i32 = arith.constant 0 : i32
    %c0_i32_0 = arith.constant 0 : i32
    return %arg0, %c0_i32 : i32, i32
  }
}

</mosaic_0001>

<bundles_post_ra>
// kernel: dia_multi_dense_forward.1
= control target key start
LH: loop header
LB: loop body
LE: loop exit
PB: predicated region body
PF: predicated region fallthrough
CT: control target
= control target key end

     0   :  { %v571_v1 = vmov 0.0   ;;  %vm572_vm0 = vmmov 0   ;;  %s754_s0 = inlined_call_operand.vmem [shape: bf16[8,32], index: 0, kind: input, shape index: {}]   ;;  %s755_s1 = inlined_call_operand.vmem [shape: bf16[32,32], index: 1, kind: input, shape index: {}]   ;;  %s756_s2 = inlined_call_operand.vmem [shape: f32[1,32], index: 2, kind: input, shape index: {}]   ;;  %s757_s3 = inlined_call_operand.vmem [shape: bf16[32,4], index: 3, kind: input, shape index: {}]   ;;  %s758_s4 = inlined_call_operand.vmem [shape: f32[1,4], index: 4, kind: input, shape index: {}]   ;;  %s759_s5 = inlined_call_operand.vmem [shape: bf16[4,16], index: 5, kind: input, shape index: {}]   ;;  %s760_s6 = inlined_call_operand.vmem [shape: f32[1,16], index: 6, kind: input, shape index: {}]   ;;  %s761_s7 = inlined_call_operand.vmem [shape: bf16[4,16], index: 7, kind: input, shape index: {}]   ;;  %s762_s8 = inlined_call_operand.vmem [shape: f32[1,16], index: 8, kind: input, shape index: {}]   ;;  %s763_s9 = inlined_call_operand.vmem [shape: s32[8,8], index: 9, kind: input, shape index: {}]   ;;  %s764_s10 = inlined_call_operand.vmem [shape: s32[8,1], index: 10, kind: input, shape index: {}]   ;;  %s765_s11 = inlined_call_operand.vmem [shape: f32[8,1], index: 11, kind: output, shape index: {0}]   ;;  %s766_s12 = inlined_call_operand.hbm [shape: s32[8,16], index: 12, kind: output, shape index: {1}]  }
   0x1   :  { %v537_v0 = vld [vmem:[%s755_s1 + $0x8] sm:$0xff]   ;;  %486 = vmatprep.subr.bf16.mxu0 %v571_v1  ;;  %494 = vmatprep.subr.bf16.mxu1 %v571_v1  ;;  %v538_v2 = vld [vmem:[%s755_s1] sm:$0xff]  }
   0x2   :  { %487 = vmatpush3.bf16.msra.mxu0 %v537_v0  ;;  %490 = vmatprep.mubr.msk.bf16.mxu0 %vm572_vm0, %v571_v1 }
   0x3   :  { %488 = vmatprep.subr.bf16.mxu0 %v571_v1  ;;  %498 = vmatprep.mubr.msk.bf16.mxu1 %vm572_vm0, %v571_v1 }
   0x4   :  { %18 = vsyncpa [#allocation3], 0  ;;  %v42_v3 = vld [vmem:[%s754_s0] sm:$0xf]  ;;  %vm66_vm1 = vcmask 261120   ;;  %v539_v4 = vld [vmem:[%s757_s3 + $0x8] sm:$0xff]   ;;  %v295_v51 = vlaneseq }
   0x5   :  { %495 = vmatpush3.bf16.msra.mxu1 %v539_v4  ;;  %v540_v5 = vld [vmem:[%s757_s3] sm:$0xff]   ;;  %vm194_vm2 = vcmask 1041408   ;;  %v573_v20 = vmov 1   ;;  %v574_v21 = vmov 2   ;;  %v575_v22 = vmov 0  }
   0x6   :  { %489 = vmatpush3.bf16.msra.mxu0 %v538_v2  ;;  %496 = vmatprep.subr.bf16.mxu1 %v571_v1  ;;  %v456_v6 = vld [vmem:[%s756_s2] ss:$0 sm:$0xff]  ;;  %v576_v27 = vmov 3   ;;  %v577_v28 = vmov 5   ;;  %v578_v29 = vmov 4   ;;  %v579_v33 = vmov 6  }
   0x7   :  { %502 = vmatprep.subr.bf16.mxu0 %v571_v1  ;;  %v182_v14 = vld [vmem:[%s759_s5] sm:$0x3]  ;;  %525 = vset.pattern.permute.xlu1 %v573_v20  ;;  %v580_v34 = vmov 7   ;;  %vm190_vm12 = vcmask 31744   ;;  %v709_v53 = vand.u32 127, %v295_v51 }
   0x8   :  { %v238_v15 = vld [vmem:[%s761_s7] sm:$0x3]  ;;  %v196_v16 = vsel %vm194_vm2, %v182_v14, 0  ;;  %527 = vset.pattern.permute.xlu0 %v574_v21 }
   0x9   :  { %491 = vmatmul.mubr.msk.bf16.vlgmr.msra.gmra.mxu0 %vm66_vm1, %v42_v3  ;;  %497 = vmatpush3.bf16.msra.mxu1 %v540_v5  ;;  %v247_v17 = vsel %vm194_vm2, %v238_v15, 0  ;;  %v293_v18 = vld [vmem:[%s763_s9] sm:$0xff] }
   0xa   :  { %504 = vmatprep.mubr.msk.bf16.mxu0 %vm572_vm0, %v571_v1  ;;  %508 = vmatprep.subr.bf16.mxu1 %v571_v1  ;;  %v294_v19 = vld [vmem:[%s764_s10] sm:$0xff] }
   0xb   :  { %503 = vmatpush3.bf16.msra.mxu0 %v196_v16  ;;  %vm315_vm3 = vcmp.gt.s32.totalorder %v294_v19, 1  ;;  %312 = vperm.xlu1 %525, %v293_v18   ;;  %vm329_vm4 = vcmp.gt.s32.totalorder %v294_v19, 2  ;;  %vm301_vm5 = vcmp.gt.s32.totalorder %v294_v19, 0  ;;  %vm343_vm6 = vcmp.gt.s32.totalorder %v294_v19, 3  ;;  %v460_v36 = vld [vmem:[%s758_s4] ss:$0 sm:$0xff] }
   0xc   :  { %326 = vperm.xlu0 %527, %v293_v18   ;;  %v316_v23 = vsel %vm315_vm3, 1, %v575_v22  ;;  %v330_v24 = vsel %vm329_vm4, 1, %v575_v22  ;;  %v302_v25 = vsel %vm301_vm5, 1, %v575_v22  ;;  %v344_v26 = vsel %vm343_vm6, 1, %v575_v22  ;;  %v464_v55 = vld [vmem:[%s760_s6] ss:$0 sm:$0xff] }
   0xd   :  { %vm385_vm7 = vcmp.gt.s32.totalorder %v294_v19, 6  ;;  %vm357_vm8 = vcmp.gt.s32.totalorder %v294_v19, 4  ;;  %vm371_vm9 = vcmp.gt.s32.totalorder %v294_v19, 5  ;;  %vm399_vm10 = vcmp.gt.s32.totalorder %v294_v19, 7  ;;  %v466_v56 = vld [vmem:[%s762_s8] ss:$0 sm:$0xff] }
   0xe   :  { %v386_v30 = vsel %vm385_vm7, 1, %v575_v22  ;;  %v358_v31 = vsel %vm357_vm8, 1, %v575_v22  ;;  %v372_v32 = vsel %vm371_vm9, 1, %v575_v22  ;;  %v400_v35 = vsel %vm399_vm10, 1, %v575_v22  ;;  %s581_s6 = smov [#allocation2]  }
   0xf   :  { %526 = vset.pattern.permute.xlu1 %v575_v22  ;;  %s446_s8 = sshll.u32 %s581_s6, 4  ;;  %s447_s8 = int_to_ptr.vmem [resolvable:$true] %s446_s8 }
  0x10   :  { %528 = vset.pattern.permute.xlu0 %v575_v22  ;;  %318 = vperm.xlu1 %526, %v316_v23   ;;  %s549_s20 = scalar_lea.vmem %s447_s8, 128  ;;  %p554_p1 = scmp.lt.s32.totalorder %s447_s8, %s447_s8 }
  0x11   :  { %298 = vperm.xlu0 %528, %v293_v18   ;;  %p550_p0 = scmp.ne.s32.totalorder %s447_s8, %s549_s20  ;;  %p555_p2 = scmp.lt.s32.totalorder %s549_s20, %s549_s20 }
  0x13   :  { %p556_p3 = por %p555_p2, %p554_p1 }
  0x14   :  { %332 = vperm.xlu1 %526, %v330_v24  }
  0x15   :  { %304 = vperm.xlu0 %528, %v302_v25   ;;  %p557_p4 = pnand %p556_p3, %p550_p0 }
  0x18   :  { %529 = vset.pattern.permute.xlu1 %v576_v27 }
  0x19   :  { %346 = vperm.xlu0 %528, %v344_v26   ;;  %340 = vperm.xlu1 %529, %v293_v18  }
  0x1d   :  { %532 = vset.pattern.permute.xlu0 %v577_v28  ;;  %530 = vset.pattern.permute.xlu1 %v578_v29 }
  0x1e   :  { %368 = vperm.xlu0 %532, %v293_v18   ;;  %354 = vperm.xlu1 %530, %v293_v18  }
  0x22   :  { %534 = vset.pattern.permute.xlu0 %v575_v22  ;;  %531 = vset.pattern.permute.xlu1 %v575_v22 }
  0x23   :  { %388 = vperm.xlu0 %534, %v386_v30   ;;  %360 = vperm.xlu1 %531, %v358_v31  }
  0x27   :  { %374 = vperm.xlu1 %531, %v372_v32  }
  0x2b   :  { %533 = vset.pattern.permute.xlu1 %v579_v33 }
  0x2c   :  { %382 = vperm.xlu1 %533, %v293_v18  }
  0x30   :  { %535 = vset.pattern.permute.xlu1 %v580_v34 }
  0x31   :  { %396 = vperm.xlu1 %535, %v293_v18  }
  0x35   :  { %536 = vset.pattern.permute.xlu1 %v575_v22 }
  0x36   :  { %402 = vperm.xlu1 %536, %v400_v35  }
  0x86   :  { %v313_v45 = vpop.permute.xlu1 %312 }
  0x87   :  { %v327_v48 = vpop.permute.xlu0 %326 }
  0x88   :  { %vm328_vm6 = vcmp.eq.s32.totalorder %v327_v48, %v709_v53 }
  0x8b   :  { %v319_v46 = vpop.permute.xlu1 %318 }
  0x8c   :  { %v299_v50 = vpop.permute.xlu0 %298  ;;  %vm320_vm2 = vcmp.eq.s32.totalorder %v319_v46, 1 }
  0x8d   :  { %vm300_vm13 = vcmp.eq.s32.totalorder %v299_v50, %v709_v53 }
  0x8f   :  { %v333_v47 = vpop.permute.xlu1 %332 }
  0x90   :  { %v305_v54 = vpop.permute.xlu0 %304  ;;  %vm334_vm5 = vcmp.eq.s32.totalorder %v333_v47, 1 }
  0x91   :  { %vm306_vm14 = vcmp.eq.s32.totalorder %v305_v54, 1  ;;  %vm335_vm7 = vmand %vm328_vm6, %vm334_vm5 }
  0x92   :  { %vm307_vm15 = vmand %vm300_vm13, %vm306_vm14  ;;  %v470_v19 = vsel %vm335_vm7, 1.0, %v571_v1 }
  0x94   :  { %v341_v49 = vpop.permute.xlu1 %340  ;;  %v347_v15 = vpop.permute.xlu0 %346 }
  0x95   :  { %vm342_vm8 = vcmp.eq.s32.totalorder %v341_v49, %v709_v53  ;;  %vm348_vm9 = vcmp.eq.s32.totalorder %v347_v15, 1 }
  0x96   :  { %vm349_vm10 = vmand %vm342_vm8, %vm348_vm9 }
  0x99   :  { %v355_v52 = vpop.permute.xlu1 %354  ;;  %v369_v20 = vpop.permute.xlu0 %368 }
  0x9e   :  { %v361_v59 = vpop.permute.xlu1 %360  ;;  %v389_v25 = vpop.permute.xlu0 %388 }
  0xc9   :  { %v104_v7 = vpop.f32.mrf.mxu0 }
  0xca   :  { %v105_v8 = vadd.f32 %v456_v6, %v104_v7 }
  0xcb   :  { %v492_v9 = vpop.f32.mrf.mxu0 }
  0xcc   :  { %v110_v10 = vmax.f32 %v105_v8, 0.0  ;;  %v468_v8 = vsel %vm307_vm15, 1.0, %v571_v1  ;;  %vm370_vm15 = vcmp.eq.s32.totalorder %v369_v20, %v709_v53 }
  0xcd   :  { %v107_v11 = vpop.f32.mrf.mxu0  ;;  %v310_v14 = vmax.f32 %v468_v8, 0.0 }
  0xce   :  { %v111_v12 = vpack.c.bf16 %v110_v10, %v110_v10  ;;  %v375_v11 = vpop.permute.xlu1 %374 }
  0xcf   :  { %v493_v13 = vpop.f32.mrf.mxu0  ;;  %vm376_vm14 = vcmp.eq.s32.totalorder %v375_v11, 1 }
  0xd0   :  { %499 = vmatmul.mubr.msk.bf16.vlgmr.msra.gmra.mxu1 %vm66_vm1, %v111_v12  ;;  %vm314_vm1 = vcmp.eq.s32.totalorder %v313_v45, %v709_v53 }
  0xd1   :  { %510 = vmatprep.mubr.msk.bf16.mxu1 %vm572_vm0, %v571_v1  ;;  %509 = vmatpush3.bf16.msra.mxu1 %v247_v17  ;;  %vm291_vm0 = vcmask 130048   ;;  %vm321_vm4 = vmand %vm314_vm1, %vm320_vm2 }
  0xd2   :  { %v469_v16 = vsel %vm321_vm4, 1.0, %v571_v1  ;;  %v383_v18 = vpop.permute.xlu1 %382  ;;  %vm377_vm1 = vmand %vm370_vm15, %vm376_vm14 }
  0xd3   :  { %v324_v17 = vmax.f32 %v310_v14, %v469_v16  ;;  %vm384_vm2 = vcmp.eq.s32.totalorder %v383_v18, %v709_v53  ;;  %v473_v33 = vsel %vm377_vm1, 1.0, %v571_v1 }
  0xd5   :  { %v338_v21 = vmax.f32 %v324_v17, %v470_v19 }
  0xd6   :  { %v397_v23 = vpop.permute.xlu1 %396 }
  0xd7   :  { %vm398_vm5 = vcmp.eq.s32.totalorder %v397_v23, %v709_v53 }
  0xda   :  { %v403_v32 = vpop.permute.xlu1 %402 }
  0xdb   :  { %vm404_vm6 = vcmp.eq.s32.totalorder %v403_v32, 1 }
  0xdc   :  { %vm405_vm7 = vmand %vm398_vm5, %vm404_vm6 }
 0x190   :  { %v172_v37 = vpop.f32.mrf.mxu1 }
 0x191   :  { %v173_v38 = vadd.f32 %v460_v36, %v172_v37  ;;  %v475_v37 = vsel %vm405_vm7, 1.0, %v571_v1 }
 0x192   :  { %v500_v39 = vpop.f32.mrf.mxu1 }
 0x193   :  { %vm178_vm11 = vcmp.ge.f32.partialorder %v173_v38, 0.0  ;;  %v179_v40 = vmul.f32 0.2, %v173_v38 }
 0x194   :  { %v175_v41 = vpop.f32.mrf.mxu1 }
 0x195   :  { %v180_v42 = vsel %vm178_vm11, %v173_v38, %v179_v40  ;;  %vm356_vm11 = vcmp.eq.s32.totalorder %v355_v52, %v709_v53 }
 0x196   :  { %v181_v43 = vpack.c.bf16 %v180_v42, %v180_v42  ;;  %v501_v44 = vpop.f32.mrf.mxu1 }
 0x198   :  { %505 = vmatmul.mubr.msk.bf16.vlgmr.msra.gmra.mxu0 %vm190_vm12, %v181_v43  ;;  %511 = vmatmul.mubr.msk.bf16.vlgmr.msra.gmra.mxu1 %vm190_vm12, %v181_v43  ;;  %vm362_vm12 = vcmp.eq.s32.totalorder %v361_v59, 1 }
 0x199   :  { %vm363_vm13 = vmand %vm356_vm11, %vm362_vm12 }
 0x19a   :  { %v472_v27 = vsel %vm363_vm13, 1.0, %v571_v1 }
 0x258   :  { %v232_v57 = vpop.f32.mrf.mxu0  ;;  %v283_v58 = vpop.f32.mrf.mxu1 }
 0x259   :  { %v718_v60 = vadd.f32 %v464_v55, %v232_v57  ;;  %v720_v61 = vadd.f32 %v466_v56, %v283_v58 }
 0x25a   :  { %v506_v62 = vpop.f32.mrf.mxu0  ;;  %v512_v63 = vpop.f32.mrf.mxu1 }
 0x25b   :  { %v410_v0 = vand.u32 2147483647, %v718_v60  ;;  %v421_v2 = vand.u32 2147483647, %v720_v61  ;;  %vm289_vm3 = vcmp.gt.f32.partialorder %v720_v61, %v718_v60  ;;  %v409_v41 = vmin.f32 %v718_v60, 0.0 }
 0x25c   :  { %v235_v3 = vpop.f32.mrf.mxu0  ;;  %v286_v4 = vpop.f32.mrf.mxu1  ;;  %v290_v7 = vsel %vm289_vm3, 1, %v575_v22  ;;  %v471_v22 = vsel %vm349_vm10, 1.0, %v571_v1  ;;  %vm390_vm3 = vcmp.eq.s32.totalorder %v389_v25, 1  ;;  %v420_v47 = vmin.f32 %v720_v61, 0.0 }
 0x25d   :  { %v411_v5 = vsub.f32 0.0, %v410_v0  ;;  %v422_v6 = vsub.f32 0.0, %v421_v2  ;;  %292 = vst.msk [vmem:[#allocation2] sm:$0xff] %vm291_vm0, %v290_v7  ;;  %v352_v24 = vmax.f32 %v338_v21, %v471_v22  ;;  %vm391_vm4 = vmand %vm384_vm2, %vm390_vm3 }
 0x25e   :  { %v507_v9 = vpop.f32.mrf.mxu0  ;;  %v513_v10 = vpop.f32.mrf.mxu1  ;;  %v474_v35 = vsel %vm391_vm4, 1.0, %v571_v1 }
 0x25f   :  { %v412_v12 = vmul.f32 1.442695, %v411_v5  ;;  %v423_v13 = vmul.f32 1.442695, %v422_v6  ;;  %v366_v31 = vmax.f32 %v352_v24, %v472_v27 }
 0x261   :  { %541 = vpow2.f32 %v412_v12  ;;  %v380_v34 = vmax.f32 %v366_v31, %v473_v33 }
 0x262   :  { %543 = vpow2.f32 %v423_v13 }
 0x263   :  { %v394_v36 = vmax.f32 %v380_v34, %v474_v35 }
 0x265   :  { %v408_v38 = vmax.f32 %v394_v36, %v475_v37 }
 0x267   :  { %v430_v44 = vsub.f32 1.0, %v408_v38  ;;  %v418_v46 = vmul.f32 %v408_v38, %v718_v60 }
 0x269   :  { %v431_v51 = vmul.f32 %v430_v44, %v720_v61 }
 0x26e   :  { %v542_v26 = vpop.eup %541 }
 0x26f   :  { %v544_v28 = vpop.eup %543  ;;  %v414_v29 = vadd.f32 1.0, %v542_v26 }
 0x270   :  { %v425_v30 = vadd.f32 1.0, %v544_v28 }
 0x271   :  { %545 = vlog2.f32 %v414_v29 }
 0x272   :  { %547 = vlog2.f32 %v425_v30 }
 0x27e   :  { %v546_v39 = vpop.eup %545 }
 0x27f   :  { %v548_v40 = vpop.eup %547  ;;  %v416_v42 = vmul.f32 0.6931472, %v546_v39 }
 0x280   :  { %v427_v43 = vmul.f32 0.6931472, %v548_v40 }
 0x281   :  { %v417_v45 = vsub.f32 %v409_v41, %v416_v42 }
 0x282   :  { %v428_v49 = vsub.f32 %v420_v47, %v427_v43 }
 0x283   :  { %v419_v48 = vsub.f32 %v417_v45, %v418_v46 }
 0x285   :  { %v429_v50 = vadd.f32 %v428_v49, %v419_v48 }
 0x287   :  { %v432_v52 = vsub.f32 %v429_v50, %v431_v51 }
 0x289   :  { %v433_v1 = vsel %vm291_vm0, %v432_v52, 0.0 }
 0x28a   :  { %434 = vadd.xlane.f32.xlu0 %v433_v1 }
 0x28b   :  { %560 = shalt.err (!%p557_p4)
}
 0x28c   :  { %449 = dma.vmem_to_hbm [thread:$0]  %s447_s8, 128, %s766_s12, [#allocation3]   ;;  %vm436_vm8 = vcmask 7168  }
 0x313   :  { %v435_v53 = vpop.xlane.xlu0 %434 }
 0x314   :  { %437 = vst.msk [vmem:[%s765_s11] sm:$0xff] %vm436_vm8, %v435_v53 }
 0x315   :  { %569 = dma.done.wait [#allocation3], 128  }
 0x316   :  { %570 = vsyncadd [#allocation3], 4294967168 }
 0x317   :  { %455 = vsyncpa [#allocation3], 1 }

</bundles_post_ra>
